<compile_context>
chip_gen: v6e
topology: v6e:2x2x1
jax: 0.10.0
libtpu: 0.0.40
codegen_flags: <defaults>
</compile_context>

<pallas_src>
import functools
import math

import jax
import jax.numpy as jnp
from jax.experimental import pallas as pl
from jax.experimental.pallas import tpu as pltpu


def _pe_kernel(x_ref, w_ref, b_ref, pos_ref, o_ref):
    # x_ref:   (rows, D_in)   rows of x for this block (batch dim flattened/squeezed)
    # w_ref:   (D_in, D_out)  linear weight, already transposed (y = x @ w_ref)
    # b_ref:   (1, D_out)     linear bias
    # pos_ref: (rows, D_out)  positional rows aligned with this block's rows
    # o_ref:   (rows, D_out)
    y = jnp.dot(x_ref[...], w_ref[...], preferred_element_type=jnp.float32)
    y = jnp.maximum(y + b_ref[...], 0.0)          # bias + ReLU
    o_ref[...] = (y + pos_ref[...]).astype(o_ref.dtype)


def learnable_positional_encoding(x, emb_weight, lin_weight, lin_bias,
                                  *, x_tile_budget_bytes=2 * 1024 * 1024,
                                  vmem_limit_bytes=32 * 1024 * 1024):
    """x: (B, S, D) float32. emb_weight: (max_len, D). lin_weight: (D, D) in PyTorch
    layout (y = x @ lin_weight.T + lin_bias). lin_bias: (D,)."""
    B, S, D = x.shape
    elem = x.dtype.itemsize

    wt = lin_weight.T                   # one-time XLA transpose of a static weight
    bias2d = lin_bias.reshape(1, D)
    pos = emb_weight[:S, :]             # rows for positions 0..S-1 (== embedding(arange(S)))

    # Target ~x_tile_budget_bytes of x per grid step (measured roofline keeps improving
    # with tile size); never below 8 rows (sublane granule).
    budget_rows = max(8, x_tile_budget_bytes // max(1, D * elem))

    cost = pl.CostEstimate(
        flops=2 * B * S * D * D + 3 * B * S * D,
        transcendentals=0,
        bytes_accessed=(x.size + wt.size + bias2d.size + pos.size + B * S * D) * elem,
    )

    def _invariant(shape, index_map, single_buffer):
        if single_buffer:
            # Grid-invariant operand: double-buffering buys nothing, halve its VMEM.
            return pl.BlockSpec(shape, index_map, pipeline_mode=pl.Buffered(1))
        return pl.BlockSpec(shape, index_map)

    # ---------------- tiling plan ----------------
    whole_seq = S <= budget_rows        # at least one full sequence fits the budget
    if whole_seq:
        k = max(1, min(B, budget_rows // S))      # sequences per row block
        tm = k * S
        if tm % 8 != 0 and tm != B * S:
            # round k up so tm is a multiple of 8 (sublane rule); else use the 2-D grid
            f = 8 // math.gcd(S, 8)
            k_aligned = -(-k // f) * f
            if k_aligned <= B:
                k, tm = k_aligned, k_aligned * S
            else:
                whole_seq = False

    if whole_seq:
        # 1-D grid over flattened (B*S) rows; tm is a whole number of sequences, so the
        # positional rows are pre-tiled ONCE in the wrapper and stay resident.
        x_arg = x.reshape(B * S, D)                          # free reshape
        pos_arg = jnp.tile(pos, (k, 1)) if k > 1 else pos    # (tm, D), built once by XLA
        grid = (pl.cdiv(B, k),)

        def build(single_buffer):
            return pl.pallas_call(
                _pe_kernel,
                out_shape=jax.ShapeDtypeStruct((B * S, D), x.dtype),
                grid_spec=pltpu.PrefetchScalarGridSpec(
                    num_scalar_prefetch=0,
                    grid=grid,
                    in_specs=[
                        pl.BlockSpec((tm, D), lambda i: (i, 0)),            # x rows
                        _invariant((D, D), lambda i: (0, 0), single_buffer),  # W^T
                        _invariant((1, D), lambda i: (0, 0), single_buffer),  # bias
                        _invariant((tm, D), lambda i: (0, 0), single_buffer),  # pos rows
                    ],
                    out_specs=pl.BlockSpec((tm, D), lambda i: (i, 0)),
                ),
                compiler_params=pltpu.CompilerParams(
                    dimension_semantics=("parallel",),
                    vmem_limit_bytes=vmem_limit_bytes,
                ),
                cost_estimate=cost,
            )

        def finish(o):
            return o.reshape(B, S, D)
    else:
        # 2-D grid (batch, seq-block): tile size decoupled from S. ts is a multiple of 8
        # (or the full S), so any (S, D) stays inside the VMEM budget.
        ts = S if S <= budget_rows else max(8, (budget_rows // 8) * 8)
        grid = (B, pl.cdiv(S, ts))
        x_arg, pos_arg = x, pos

        def build(single_buffer):
            return pl.pallas_call(
                _pe_kernel,
                out_shape=jax.ShapeDtypeStruct((B, S, D), x.dtype),
                grid_spec=pltpu.PrefetchScalarGridSpec(
                    num_scalar_prefetch=0,
                    grid=grid,
                    in_specs=[
                        pl.BlockSpec((None, ts, D), lambda b, j: (b, j, 0)),      # x (batch squeezed)
                        _invariant((D, D), lambda b, j: (0, 0), single_buffer),   # W^T
                        _invariant((1, D), lambda b, j: (0, 0), single_buffer),   # bias
                        pl.BlockSpec((ts, D), lambda b, j: (j, 0)),               # pos slice (varies with j)
                    ],
                    out_specs=pl.BlockSpec((None, ts, D), lambda b, j: (b, j, 0)),
                ),
                compiler_params=pltpu.CompilerParams(
                    dimension_semantics=("parallel", "parallel"),
                    vmem_limit_bytes=vmem_limit_bytes,
                ),
                cost_estimate=cost,
            )

        def finish(o):
            return o

    try:
        out = build(True)(x_arg, wt, bias2d, pos_arg)
    except Exception:
        # pipeline_mode=pl.Buffered(1) not supported by this jax build: plain specs.
        out = build(False)(x_arg, wt, bias2d, pos_arg)
    return finish(out)


def reference(x, emb_weight, lin_weight, lin_bias):
    # pure-JAX reference mirroring the PyTorch forward (eval mode, dropout = identity)
    S = x.shape[1]
    pos_emb = emb_weight[jnp.arange(S)][None, :, :]            # (1, S, D)
    x_proj = jnp.einsum("bsd,ed->bse", x, lin_weight) + lin_bias
    x_proj = jax.nn.relu(x_proj)
    return x_proj + pos_emb


if __name__ == "__main__":
    d_model = 32
    max_len = 1000
    batch, seq = 2, 8

    key = jax.random.PRNGKey(0)
    k_emb, k_w, k_b, k_x = jax.random.split(key, 4)

    # Deterministic parameter init (shapes per nn.Embedding(max_len, d_model),
    # nn.Linear(d_model, d_model)).
    # kaiming_uniform(fan_in=d_model, relu): bound = sqrt(2) * sqrt(3 / d_model)
    bound_emb = (2.0 ** 0.5) * (3.0 / d_model) ** 0.5
    emb_weight = jax.random.uniform(
        k_emb, (max_len, d_model), jnp.float32, -bound_emb, bound_emb)
    bound_lin = 1.0 / (d_model ** 0.5)
    lin_weight = jax.random.uniform(
        k_w, (d_model, d_model), jnp.float32, -bound_lin, bound_lin)
    lin_bias = jax.random.uniform(
        k_b, (d_model,), jnp.float32, -bound_lin, bound_lin)

    x = jax.random.normal(k_x, (batch, seq, d_model), jnp.float32)

    # Main (whole-sequence tiling) path.
    out = learnable_positional_encoding(x, emb_weight, lin_weight, lin_bias)
    out = jax.block_until_ready(out)
    ref = reference(x, emb_weight, lin_weight, lin_bias)
    assert out.shape == (batch, seq, d_model)
    assert jnp.allclose(out, ref, atol=1e-5, rtol=1e-5), "mismatch vs reference"

    # Also exercise the sequence-tiled (2-D grid) path with a tiny budget override.
    x2 = jax.random.normal(jax.random.PRNGKey(1), (batch, 24, d_model), jnp.float32)
    out2 = learnable_positional_encoding(
        x2, emb_weight, lin_weight, lin_bias, x_tile_budget_bytes=1024)
    out2 = jax.block_until_ready(out2)
    ref2 = reference(x2, emb_weight, lin_weight, lin_bias)
    assert jnp.allclose(out2, ref2, atol=1e-5, rtol=1e-5), "mismatch vs reference (seq-tiled)"

    print("KERNEL_OK")
</pallas_src>

<mosaic_0001>
module attributes {stable_mosaic.version = 11 : i64} {
  func.func @_pe_kernel(%arg0: i32, %arg1: memref<16x32xf32, #tpu.memory_space<vmem>>, %arg2: memref<32x32xf32, #tpu.memory_space<vmem>>, %arg3: memref<1x32xf32, #tpu.memory_space<vmem>>, %arg4: memref<16x32xf32, #tpu.memory_space<vmem>>, %arg5: memref<16x32xf32, #tpu.memory_space<vmem>>) attributes {dimension_semantics = [#tpu.dimension_semantics<parallel>], iteration_bounds = array<i64: 1>, scalar_prefetch = 0 : i64, scratch_operands = 0 : i64, tpu.core_type = #tpu.core_type<tc>, window_params = [{transform_indices = @transform_0, window_bounds = array<i64: 16, 32>}, {pipeline_mode = #tpu.pipeline_mode<synchronous>, transform_indices = @transform_1, window_bounds = array<i64: 32, 32>}, {pipeline_mode = #tpu.pipeline_mode<synchronous>, transform_indices = @transform_2, window_bounds = array<i64: 1, 32>}, {pipeline_mode = #tpu.pipeline_mode<synchronous>, transform_indices = @transform_3, window_bounds = array<i64: 16, 32>}, {transform_indices = @transform_4, window_bounds = array<i64: 16, 32>}]} {
    %c0 = arith.constant 0 : index
    %c0_0 = arith.constant 0 : index
    %0 = vector.load %arg1[%c0, %c0_0] : memref<16x32xf32, #tpu.memory_space<vmem>>, vector<16x32xf32>
    %c0_1 = arith.constant 0 : index
    %c0_2 = arith.constant 0 : index
    %1 = vector.load %arg2[%c0_1, %c0_2] : memref<32x32xf32, #tpu.memory_space<vmem>>, vector<32x32xf32>
    %cst = arith.constant dense<0.000000e+00> : vector<16x32xf32>
    %2 = tpu.matmul %0, %1, %cst {dimension_numbers = #tpu.dot_dimension_numbers<[1], [0], [0], [1], [0, 0, 1, 1], [], []>} : vector<16x32xf32>, vector<32x32xf32>, vector<16x32xf32> -> vector<16x32xf32>
    %c0_3 = arith.constant 0 : index
    %c0_4 = arith.constant 0 : index
    %3 = vector.load %arg3[%c0_3, %c0_4] : memref<1x32xf32, #tpu.memory_space<vmem>>, vector<1x32xf32>
    %4 = vector.broadcast %3 : vector<1x32xf32> to vector<16x32xf32>
    %5 = arith.addf %2, %4 : vector<16x32xf32>
    %cst_5 = arith.constant 0.000000e+00 : f32
    %6 = vector.broadcast %cst_5 : f32 to vector<16x32xf32>
    %7 = arith.maximumf %5, %6 : vector<16x32xf32>
    %c0_6 = arith.constant 0 : index
    %c0_7 = arith.constant 0 : index
    %8 = vector.load %arg4[%c0_6, %c0_7] : memref<16x32xf32, #tpu.memory_space<vmem>>, vector<16x32xf32>
    %9 = arith.addf %7, %8 : vector<16x32xf32>
    %c0_8 = arith.constant 0 : index
    %c0_9 = arith.constant 0 : index
    %10 = vector.load %arg5[%c0_8, %c0_9] : memref<16x32xf32, #tpu.memory_space<vmem>>, vector<16x32xf32>
    tpu.vector_store %arg5[%c0_8, %c0_9], %9 {strides = array<i32>} : memref<16x32xf32, #tpu.memory_space<vmem>>, vector<16x32xf32>,
    return
  }
  func.func @transform_0(%arg0: i32) -> (i32, i32) {
    %c0_i32 = arith.constant 0 : i32
    %c0_i32_0 = arith.constant 0 : i32
    return %arg0, %c0_i32 : i32, i32
  }
  func.func @transform_1(%arg0: i32) -> (i32, i32) {
    %c0_i32 = arith.constant 0 : i32
    %c0_i32_0 = arith.constant 0 : i32
    %c0_i32_1 = arith.constant 0 : i32
    return %c0_i32, %c0_i32_0 : i32, i32
  }
  func.func @transform_2(%arg0: i32) -> (i32, i32) {
    %c0_i32 = arith.constant 0 : i32
    %c0_i32_0 = arith.constant 0 : i32
    %c0_i32_1 = arith.constant 0 : i32
    return %c0_i32, %c0_i32_0 : i32, i32
  }
  func.func @transform_3(%arg0: i32) -> (i32, i32) {
    %c0_i32 = arith.constant 0 : i32
    %c0_i32_0 = arith.constant 0 : i32
    %c0_i32_1 = arith.constant 0 : i32
    return %c0_i32, %c0_i32_0 : i32, i32
  }
  func.func @transform_4(%arg0: i32) -> (i32, i32) {
    %c0_i32 = arith.constant 0 : i32
    %c0_i32_0 = arith.constant 0 : i32
    return %arg0, %c0_i32 : i32, i32
  }
}

module attributes {stable_mosaic.version = 11 : i64} {
  func.func @_pe_kernel(%arg0: i32, %arg1: memref<16x32xf32, #tpu.memory_space<vmem>>, %arg2: memref<32x32xf32, #tpu.memory_space<vmem>>, %arg3: memref<1x32xf32, #tpu.memory_space<vmem>>, %arg4: memref<16x32xf32, #tpu.memory_space<vmem>>, %arg5: memref<16x32xf32, #tpu.memory_space<vmem>>) attributes {dimension_semantics = [#tpu.dimension_semantics<parallel>], iteration_bounds = array<i64: 1>, scalar_prefetch = 0 : i64, scratch_operands = 0 : i64, tpu.core_type = #tpu.core_type<tc>, window_params = [{transform_indices = @transform_0, window_bounds = array<i64: 16, 32>}, {pipeline_mode = #tpu.pipeline_mode<synchronous>, transform_indices = @transform_1, window_bounds = array<i64: 32, 32>}, {pipeline_mode = #tpu.pipeline_mode<synchronous>, transform_indices = @transform_2, window_bounds = array<i64: 1, 32>}, {pipeline_mode = #tpu.pipeline_mode<synchronous>, transform_indices = @transform_3, window_bounds = array<i64: 16, 32>}, {transform_indices = @transform_4, window_bounds = array<i64: 16, 32>}]} {
    %c0 = arith.constant 0 : index
    %c0_0 = arith.constant 0 : index
    %0 = vector.load %arg1[%c0, %c0_0] : memref<16x32xf32, #tpu.memory_space<vmem>>, vector<16x32xf32>
    %c0_1 = arith.constant 0 : index
    %c0_2 = arith.constant 0 : index
    %1 = vector.load %arg2[%c0_1, %c0_2] : memref<32x32xf32, #tpu.memory_space<vmem>>, vector<32x32xf32>
    %cst = arith.constant dense<0.000000e+00> : vector<16x32xf32>
    %2 = tpu.matmul %0, %1, %cst {dimension_numbers = #tpu.dot_dimension_numbers<[1], [0], [0], [1], [0, 0, 1, 1], [], []>} : vector<16x32xf32>, vector<32x32xf32>, vector<16x32xf32> -> vector<16x32xf32>
    %c0_3 = arith.constant 0 : index
    %c0_4 = arith.constant 0 : index
    %3 = vector.load %arg3[%c0_3, %c0_4] : memref<1x32xf32, #tpu.memory_space<vmem>>, vector<1x32xf32>
    %4 = vector.broadcast %3 : vector<1x32xf32> to vector<16x32xf32>
    %5 = arith.addf %2, %4 : vector<16x32xf32>
    %cst_5 = arith.constant 0.000000e+00 : f32
    %6 = vector.broadcast %cst_5 : f32 to vector<16x32xf32>
    %7 = arith.maximumf %5, %6 : vector<16x32xf32>
    %c0_6 = arith.constant 0 : index
    %c0_7 = arith.constant 0 : index
    %8 = vector.load %arg4[%c0_6, %c0_7] : memref<16x32xf32, #tpu.memory_space<vmem>>, vector<16x32xf32>
    %9 = arith.addf %7, %8 : vector<16x32xf32>
    %c0_8 = arith.constant 0 : index
    %c0_9 = arith.constant 0 : index
    %10 = vector.load %arg5[%c0_8, %c0_9] : memref<16x32xf32, #tpu.memory_space<vmem>>, vector<16x32xf32>
    tpu.vector_store %arg5[%c0_8, %c0_9], %9 {strides = array<i32>} : memref<16x32xf32, #tpu.memory_space<vmem>>, vector<16x32xf32>,
    return
  }
  func.func @transform_0(%arg0: i32) -> (i32, i32) {
    %c0_i32 = arith.constant 0 : i32
    %c0_i32_0 = arith.constant 0 : i32
    return %arg0, %c0_i32 : i32, i32
  }
  func.func @transform_1(%arg0: i32) -> (i32, i32) {
    %c0_i32 = arith.constant 0 : i32
    %c0_i32_0 = arith.constant 0 : i32
    %c0_i32_1 = arith.constant 0 : i32
    return %c0_i32, %c0_i32_0 : i32, i32
  }
  func.func @transform_2(%arg0: i32) -> (i32, i32) {
    %c0_i32 = arith.constant 0 : i32
    %c0_i32_0 = arith.constant 0 : i32
    %c0_i32_1 = arith.constant 0 : i32
    return %c0_i32, %c0_i32_0 : i32, i32
  }
  func.func @transform_3(%arg0: i32) -> (i32, i32) {
    %c0_i32 = arith.constant 0 : i32
    %c0_i32_0 = arith.constant 0 : i32
    %c0_i32_1 = arith.constant 0 : i32
    return %c0_i32, %c0_i32_0 : i32, i32
  }
  func.func @transform_4(%arg0: i32) -> (i32, i32) {
    %c0_i32 = arith.constant 0 : i32
    %c0_i32_0 = arith.constant 0 : i32
    return %arg0, %c0_i32 : i32, i32
  }
}

</mosaic_0001>

<bundles_post_ra>
// kernel: tpu_custom_call.1
= control target key start
LH: loop header
LB: loop body
LE: loop exit
PB: predicated region body
PF: predicated region fallthrough
CT: control target
= control target key end

     0   :  { %9 = vsyncpa [#allocation3], 0  ;;  %s354_s0 = inlined_call_operand.hbm [shape: f32[16,32], index: 0, kind: input, shape index: {}]   ;;  %s355_s1 = inlined_call_operand.hbm [shape: f32[32,32], index: 1, kind: input, shape index: {}]   ;;  %s356_s2 = inlined_call_operand.vmem [shape: f32[1,32], index: 2, kind: input, shape index: {}]   ;;  %s357_s3 = inlined_call_operand.hbm [shape: f32[16,32], index: 3, kind: input, shape index: {}]   ;;  %s358_s4 = inlined_call_operand.hbm [shape: f32[16,32], index: 4, kind: output, shape index: {}]  }
   0x1   :  { %10 = vsyncpa [#allocation6], 0 }
   0x2   :  { %11 = vsyncpa [#allocation4], 0  ;;  %s292_s15 = smov [#allocation5]   ;;  %s293_s17 = smov [#allocation2]  }
   0x3   :  { %s29_s16 = sshll.u32 %s292_s15, 4  ;;  %s17_s18 = sshll.u32 %s293_s17, 4  ;;  %s30_s16 = int_to_ptr.vmem [resolvable:$true] %s29_s16  ;;  %s18_s18 = int_to_ptr.vmem [resolvable:$true] %s17_s18 }
   0x4   :  { %s214_s19 = scalar_lea.vmem %s30_s16, 512  ;;  %p219_p1 = scmp.lt.s32.totalorder %s30_s16, %s30_s16 }
   0x5   :  { %p215_p0 = scmp.ne.s32.totalorder %s30_s16, %s214_s19  ;;  %p220_p2 = scmp.lt.s32.totalorder %s214_s19, %s214_s19 }
   0x7   :  { %p221_p3 = por %p220_p2, %p219_p1 }
   0x9   :  { %p222_p4 = pnand %p221_p3, %p215_p0 }
   0xb   :  { %225 = shalt.err (!%p222_p4)
}
   0xc   :  { %s294_s20 = smov 128   ;;  %s295_s21 = smov 8  }
   0xd   :  { %35 = dma.hbm_to_vmem [thread:$0]  %s355_s1, 512, %s30_s16, [#allocation6], %s294_s20, %s294_s20, %s295_s21  }
   0xe   :  { %s234_s24 = scalar_lea.vmem %s18_s18, 256  ;;  %p239_p6 = scmp.lt.s32.totalorder %s18_s18, %s18_s18 }
   0xf   :  { %p235_p5 = scmp.ne.s32.totalorder %s18_s18, %s234_s24  ;;  %p240_p7 = scmp.lt.s32.totalorder %s234_s24, %s234_s24 }
  0x11   :  { %p241_p8 = por %p240_p7, %p239_p6 }
  0x13   :  { %p242_p9 = pnand %p241_p8, %p235_p5 }
  0x15   :  { %245 = shalt.err (!%p242_p9)
}
  0x16   :  { %23 = dma.hbm_to_vmem [thread:$0]  %s354_s0, 256, %s18_s18, [#allocation3], %s294_s20, %s294_s20, %s295_s21  }
  0x17   :  { %s296_s27 = smov [#allocation7]  }
  0x18   :  { %s43_s28 = sshll.u32 %s296_s27, 4  ;;  %s44_s28 = int_to_ptr.vmem [resolvable:$true] %s43_s28 }
  0x19   :  { %s254_s29 = scalar_lea.vmem %s44_s28, 256  ;;  %p259_p11 = scmp.lt.s32.totalorder %s44_s28, %s44_s28 }
  0x1a   :  { %p255_p10 = scmp.ne.s32.totalorder %s44_s28, %s254_s29  ;;  %p260_p12 = scmp.lt.s32.totalorder %s254_s29, %s254_s29 }
  0x1c   :  { %p261_p13 = por %p260_p12, %p259_p11 }
  0x1e   :  { %p262_p0 = pnand %p261_p13, %p255_p10 }
  0x20   :  { %265 = shalt.err (!%p262_p0)
}
  0x21   :  { %49 = dma.hbm_to_vmem [thread:$0]  %s357_s3, 256, %s44_s28, [#allocation6], %s294_s20, %s294_s20, %s295_s21  }
  0x22   :  { %286 = dma.done.wait [#allocation3], 256  }
  0x23   :  { %287 = vsyncadd [#allocation3], 4294967040 }
  0x24   :  { %288 = dma.done.wait [#allocation6], 768  }
  0x25   :  { %289 = vsyncadd [#allocation6], 4294966528  ;;  %vm72_vm0 = vcmask 261120   ;;  %v64_v0 = vld [vmem:[#allocation5 + $0x18] sm:$0xff]  ;;  %v63_v1 = vld [vmem:[#allocation5 + $0x10] sm:$0xff]  ;;  %s297_s5 = smov [#allocation8]  }
  0x26   :  { %189 = vmatprep.subr.mxu0 %v64_v0  ;;  %v59_v2 = vld [vmem:[#allocation2] sm:$0xff]  ;;  %v62_v3 = vld [vmem:[#allocation5 + $0x8] sm:$0xff]  ;;  %v61_v4 = vld [vmem:[#allocation5] sm:$0xff]  ;;  %s167_s6 = sshll.u32 %s297_s5, 4  ;;  %s168_s6 = int_to_ptr.vmem [resolvable:$true] %s167_s6 }
  0x27   :  { %190 = vmatpush3.msra.mxu0 %v64_v0  ;;  %197 = vmatprep.mubr.msk.f32.mxu0 %vm72_vm0, %v59_v2  ;;  %v60_v5 = vld [vmem:[#allocation2 + $0x8] sm:$0xff]  ;;  %v180_v6 = vld [vmem:[%s356_s2] ss:$0 sm:$0xff]  ;;  %v157_v9 = vld [vmem:[#allocation7 + $0x8] sm:$0xff]  ;;  %s266_s7 = scalar_lea.vmem %s168_s6, 256  ;;  %p271_p2 = scmp.lt.s32.totalorder %s168_s6, %s168_s6 }
  0x28   :  { %191 = vmatprep.subr.mxu0 %v63_v1  ;;  %v156_v13 = vld [vmem:[#allocation7] sm:$0xff]  ;;  %p267_p1 = scmp.ne.s32.totalorder %s168_s6, %s266_s7  ;;  %p272_p3 = scmp.lt.s32.totalorder %s266_s7, %s266_s7 }
  0x29   :  { %192 = vmatpush3.msra.mxu0 %v63_v1 }
  0x2a   :  { %193 = vmatprep.subr.mxu0 %v62_v3  ;;  %p273_p4 = por %p272_p3, %p271_p2 }
  0x2b   :  { %194 = vmatpush3.msra.mxu0 %v62_v3 }
  0x2c   :  { %195 = vmatprep.subr.mxu0 %v61_v4  ;;  %p274_p5 = pnand %p273_p4, %p267_p1 }
  0x2d   :  { %196 = vmatpush3.msra.mxu0 %v61_v4 }
  0x2e   :  { %198 = vmatmul.mubr.msk.f32.vlgmr.msra.gmra.mxu0 %vm72_vm0, %v60_v5 }
  0xee   :  { %v199_v7 = vpop.f32.mrf.mxu0 }
  0xef   :  { %v151_v8 = vadd.f32 %v199_v7, %v180_v6 }
  0xf0   :  { %v145_v10 = vpop.f32.mrf.mxu0 }
  0xf1   :  { %v155_v11 = vmax.f32 %v151_v8, 0.0  ;;  %v146_v12 = vadd.f32 %v180_v6, %v145_v10 }
  0xf3   :  { %v159_v14 = vadd.f32 %v157_v9, %v155_v11  ;;  %v154_v15 = vmax.f32 %v146_v12, 0.0 }
  0xf5   :  { %161 = vst.msk [vmem:[#allocation8 + $0x8] sm:$0xff] %vm72_vm0, %v159_v14  ;;  %v158_v16 = vadd.f32 %v156_v13, %v154_v15 }
  0xf7   :  { %160 = vst.msk [vmem:[#allocation8] sm:$0xff] %vm72_vm0, %v158_v16 }
  0xf8   :  { %277 = shalt.err (!%p274_p5)
}
  0xf9   :  { %173 = dma.vmem_to_hbm [thread:$0]  %s168_s6, 256, %s358_s4, [#allocation4], %s294_s20, %s294_s20, %s295_s21  }
  0xfa   :  { %290 = dma.done.wait [#allocation4], 256  }
  0xfb   :  { %291 = vsyncadd [#allocation4], 4294967040 }
  0xfc   :  { %177 = vsyncpa [#allocation3], 1 }
  0xfd   :  { %178 = vsyncpa [#allocation6], 1 }
  0xfe   :  { %179 = vsyncpa [#allocation4], 1 }

// kernel: tpu_custom_call.1
= control target key start
LH: loop header
LB: loop body
LE: loop exit
PB: predicated region body
PF: predicated region fallthrough
CT: control target
= control target key end

     0   :  { %9 = vsyncpa [#allocation3], 0  ;;  %s354_s0 = inlined_call_operand.hbm [shape: f32[16,32], index: 0, kind: input, shape index: {}]   ;;  %s355_s1 = inlined_call_operand.hbm [shape: f32[32,32], index: 1, kind: input, shape index: {}]   ;;  %s356_s2 = inlined_call_operand.vmem [shape: f32[1,32], index: 2, kind: input, shape index: {}]   ;;  %s357_s3 = inlined_call_operand.hbm [shape: f32[16,32], index: 3, kind: input, shape index: {}]   ;;  %s358_s4 = inlined_call_operand.hbm [shape: f32[16,32], index: 4, kind: output, shape index: {}]  }
   0x1   :  { %10 = vsyncpa [#allocation6], 0 }
   0x2   :  { %11 = vsyncpa [#allocation4], 0  ;;  %s292_s15 = smov [#allocation5]   ;;  %s293_s17 = smov [#allocation2]  }
   0x3   :  { %s29_s16 = sshll.u32 %s292_s15, 4  ;;  %s17_s18 = sshll.u32 %s293_s17, 4  ;;  %s30_s16 = int_to_ptr.vmem [resolvable:$true] %s29_s16  ;;  %s18_s18 = int_to_ptr.vmem [resolvable:$true] %s17_s18 }
   0x4   :  { %s214_s19 = scalar_lea.vmem %s30_s16, 512  ;;  %p219_p1 = scmp.lt.s32.totalorder %s30_s16, %s30_s16 }
   0x5   :  { %p215_p0 = scmp.ne.s32.totalorder %s30_s16, %s214_s19  ;;  %p220_p2 = scmp.lt.s32.totalorder %s214_s19, %s214_s19 }
   0x7   :  { %p221_p3 = por %p220_p2, %p219_p1 }
   0x9   :  { %p222_p4 = pnand %p221_p3, %p215_p0 }
   0xb   :  { %225 = shalt.err (!%p222_p4)
}
   0xc   :  { %s294_s20 = smov 128   ;;  %s295_s21 = smov 8  }
   0xd   :  { %35 = dma.hbm_to_vmem [thread:$0]  %s355_s1, 512, %s30_s16, [#allocation6], %s294_s20, %s294_s20, %s295_s21  }
   0xe   :  { %s234_s24 = scalar_lea.vmem %s18_s18, 256  ;;  %p239_p6 = scmp.lt.s32.totalorder %s18_s18, %s18_s18 }
   0xf   :  { %p235_p5 = scmp.ne.s32.totalorder %s18_s18, %s234_s24  ;;  %p240_p7 = scmp.lt.s32.totalorder %s234_s24, %s234_s24 }
  0x11   :  { %p241_p8 = por %p240_p7, %p239_p6 }
  0x13   :  { %p242_p9 = pnand %p241_p8, %p235_p5 }
  0x15   :  { %245 = shalt.err (!%p242_p9)
}
  0x16   :  { %23 = dma.hbm_to_vmem [thread:$0]  %s354_s0, 256, %s18_s18, [#allocation3], %s294_s20, %s294_s20, %s295_s21  }
  0x17   :  { %s296_s27 = smov [#allocation7]  }
  0x18   :  { %s43_s28 = sshll.u32 %s296_s27, 4  ;;  %s44_s28 = int_to_ptr.vmem [resolvable:$true] %s43_s28 }
  0x19   :  { %s254_s29 = scalar_lea.vmem %s44_s28, 256  ;;  %p259_p11 = scmp.lt.s32.totalorder %s44_s28, %s44_s28 }
  0x1a   :  { %p255_p10 = scmp.ne.s32.totalorder %s44_s28, %s254_s29  ;;  %p260_p12 = scmp.lt.s32.totalorder %s254_s29, %s254_s29 }
  0x1c   :  { %p261_p13 = por %p260_p12, %p259_p11 }
  0x1e   :  { %p262_p0 = pnand %p261_p13, %p255_p10 }
  0x20   :  { %265 = shalt.err (!%p262_p0)
}
  0x21   :  { %49 = dma.hbm_to_vmem [thread:$0]  %s357_s3, 256, %s44_s28, [#allocation6], %s294_s20, %s294_s20, %s295_s21  }
  0x22   :  { %286 = dma.done.wait [#allocation3], 256  }
  0x23   :  { %287 = vsyncadd [#allocation3], 4294967040 }
  0x24   :  { %288 = dma.done.wait [#allocation6], 768  }
  0x25   :  { %289 = vsyncadd [#allocation6], 4294966528  ;;  %vm72_vm0 = vcmask 261120   ;;  %v64_v0 = vld [vmem:[#allocation5 + $0x18] sm:$0xff]  ;;  %v63_v1 = vld [vmem:[#allocation5 + $0x10] sm:$0xff]  ;;  %s297_s5 = smov [#allocation8]  }
  0x26   :  { %189 = vmatprep.subr.mxu0 %v64_v0  ;;  %v59_v2 = vld [vmem:[#allocation2] sm:$0xff]  ;;  %v62_v3 = vld [vmem:[#allocation5 + $0x8] sm:$0xff]  ;;  %v61_v4 = vld [vmem:[#allocation5] sm:$0xff]  ;;  %s167_s6 = sshll.u32 %s297_s5, 4  ;;  %s168_s6 = int_to_ptr.vmem [resolvable:$true] %s167_s6 }
  0x27   :  { %190 = vmatpush3.msra.mxu0 %v64_v0  ;;  %197 = vmatprep.mubr.msk.f32.mxu0 %vm72_vm0, %v59_v2  ;;  %v60_v5 = vld [vmem:[#allocation2 + $0x8] sm:$0xff]  ;;  %v180_v6 = vld [vmem:[%s356_s2] ss:$0 sm:$0xff]  ;;  %v157_v9 = vld [vmem:[#allocation7 + $0x8] sm:$0xff]  ;;  %s266_s7 = scalar_lea.vmem %s168_s6, 256  ;;  %p271_p2 = scmp.lt.s32.totalorder %s168_s6, %s168_s6 }
  0x28   :  { %191 = vmatprep.subr.mxu0 %v63_v1  ;;  %v156_v13 = vld [vmem:[#allocation7] sm:$0xff]  ;;  %p267_p1 = scmp.ne.s32.totalorder %s168_s6, %s266_s7  ;;  %p272_p3 = scmp.lt.s32.totalorder %s266_s7, %s266_s7 }
  0x29   :  { %192 = vmatpush3.msra.mxu0 %v63_v1 }
  0x2a   :  { %193 = vmatprep.subr.mxu0 %v62_v3  ;;  %p273_p4 = por %p272_p3, %p271_p2 }
  0x2b   :  { %194 = vmatpush3.msra.mxu0 %v62_v3 }
  0x2c   :  { %195 = vmatprep.subr.mxu0 %v61_v4  ;;  %p274_p5 = pnand %p273_p4, %p267_p1 }
  0x2d   :  { %196 = vmatpush3.msra.mxu0 %v61_v4 }
  0x2e   :  { %198 = vmatmul.mubr.msk.f32.vlgmr.msra.gmra.mxu0 %vm72_vm0, %v60_v5 }
  0xee   :  { %v199_v7 = vpop.f32.mrf.mxu0 }
  0xef   :  { %v151_v8 = vadd.f32 %v199_v7, %v180_v6 }
  0xf0   :  { %v145_v10 = vpop.f32.mrf.mxu0 }
  0xf1   :  { %v155_v11 = vmax.f32 %v151_v8, 0.0  ;;  %v146_v12 = vadd.f32 %v180_v6, %v145_v10 }
  0xf3   :  { %v159_v14 = vadd.f32 %v157_v9, %v155_v11  ;;  %v154_v15 = vmax.f32 %v146_v12, 0.0 }
  0xf5   :  { %161 = vst.msk [vmem:[#allocation8 + $0x8] sm:$0xff] %vm72_vm0, %v159_v14  ;;  %v158_v16 = vadd.f32 %v156_v13, %v154_v15 }
  0xf7   :  { %160 = vst.msk [vmem:[#allocation8] sm:$0xff] %vm72_vm0, %v158_v16 }
  0xf8   :  { %277 = shalt.err (!%p274_p5)
}
  0xf9   :  { %173 = dma.vmem_to_hbm [thread:$0]  %s168_s6, 256, %s358_s4, [#allocation4], %s294_s20, %s294_s20, %s295_s21  }
  0xfa   :  { %290 = dma.done.wait [#allocation4], 256  }
  0xfb   :  { %291 = vsyncadd [#allocation4], 4294967040 }
  0xfc   :  { %177 = vsyncpa [#allocation3], 1 }
  0xfd   :  { %178 = vsyncpa [#allocation6], 1 }
  0xfe   :  { %179 = vsyncpa [#allocation4], 1 }

</bundles_post_ra>
